<compile_context>
chip_gen: v5e
topology: v5e:2x2
jax: 0.10.0
libtpu: 0.0.40
codegen_flags: <defaults>
</compile_context>

<pallas_src>
import functools

import jax
import jax.numpy as jnp
from jax import lax
from jax.experimental import pallas as pl
from jax.experimental.pallas import tpu as pltpu


KERNEL_SET = (2, 3, 6, 7)          # fixed in the PyTorch module
N_TAPS = max(KERNEL_SET)           # 7


def _round_up(x, m):
    return (x + m - 1) // m * m


def _dilated_inception_kernel(x_ref, w_ref, b_ref, o_ref, *, dilation, w_out):
    """One row-block: x_ref (Rt, W, Cin) -> o_ref (Rt*W_out, Cout)."""
    x = x_ref[...]                                   # (Rt, W, Cin)
    rt, _, cin = x.shape

    # im2col over the 7 dilated taps; lane order is tap-major then channel,
    # matching the packed weight row layout (t*Cin + c).
    cols = [x[:, dilation * t: dilation * t + w_out, :] for t in range(N_TAPS)]
    xcol = jnp.concatenate(cols, axis=-1)            # (Rt, W_out, 7*Cin)
    xcol = xcol.reshape(rt * w_out, N_TAPS * cin)    # (Rt*W_out, 7*Cin)

    # Single fused matmul covering all four conv branches + channel concat.
    y = jnp.dot(xcol, w_ref[...], preferred_element_type=jnp.float32)
    y = y + b_ref[...]                               # (1, Cout) broadcast
    o_ref[...] = y.astype(o_ref.dtype)


def _pack_params(weights, biases):
    """Pack four PyTorch Conv2d weights (Cout/4, Cin, 1, k) into a single
    (7*Cin, Cout) matmul weight (taps zero-padded at the front) + (1, Cout)
    bias.  Channel order matches torch.cat(dim=1) over KERNEL_SET order."""
    cin = weights[0].shape[1]
    cout_per = weights[0].shape[0]
    cout = cout_per * len(KERNEL_SET)
    wfull = jnp.zeros((cout, cin, N_TAPS), jnp.float32)
    for i, kern in enumerate(KERNEL_SET):
        w = weights[i][:, :, 0, :]                   # (cout_per, cin, kern)
        wfull = wfull.at[i * cout_per:(i + 1) * cout_per, :,
                         N_TAPS - kern:].set(w.astype(jnp.float32))
    # (Cout, Cin, T) -> (T, Cin, Cout) -> (T*Cin, Cout); row index = t*Cin + c
    wcol = jnp.transpose(wfull, (2, 1, 0)).reshape(N_TAPS * cin, cout)
    bcol = jnp.concatenate([b.astype(jnp.float32) for b in biases]).reshape(1, cout)
    return wcol, bcol


@functools.partial(jax.jit,
                   static_argnames=("dilation_factor", "row_tile", "compute_dtype"))
def dilated_inception_forward(x, weights, biases, *, dilation_factor=2,
                              row_tile=256, compute_dtype=None):
    """x: (B, Cin, H, W).  weights/biases: lists in KERNEL_SET order with
    PyTorch Conv2d shapes (Cout/4, Cin, 1, k) and (Cout/4,).
    Returns (B, Cout, H, W_out) float32 with W_out = W - dilation*(7-1)."""
    B, cin, H, W = x.shape
    w_out = W - dilation_factor * (N_TAPS - 1)
    assert w_out > 0, "sequence too short for the dilated (1,7) kernel"

    wcol, bcol = _pack_params(weights, biases)
    cout = wcol.shape[1]

    # NCHW -> (B*H, W, Cin): channels-last so the contraction dim feeds the
    # MXU directly (layout plumbing stays outside the kernel).
    xr = jnp.transpose(x, (0, 2, 3, 1)).reshape(B * H, W, cin)

    rows = B * H
    rt = _round_up(min(row_tile, _round_up(rows, 8)), 8)
    rows_pad = _round_up(rows, rt)
    if rows_pad != rows:
        xr = jnp.pad(xr, ((0, rows_pad - rows), (0, 0), (0, 0)))

    if compute_dtype is not None:     # e.g. bf16 on v6e/v7x; accumulation stays f32
        xr = xr.astype(compute_dtype)
        wcol = wcol.astype(compute_dtype)

    grid = (rows_pad // rt,)
    kernel = functools.partial(_dilated_inception_kernel,
                               dilation=dilation_factor, w_out=w_out)

    out2d = pl.pallas_call(
        kernel,
        out_shape=jax.ShapeDtypeStruct((rows_pad * w_out, cout), jnp.float32),
        grid_spec=pltpu.PrefetchScalarGridSpec(
            num_scalar_prefetch=0,
            grid=grid,
            in_specs=[
                pl.BlockSpec((rt, W, cin), lambda i: (i, 0, 0)),     # row block
                # Constant blocks (same tile every step).
                # TODO(synk): on VMEM-tight v7x configs, pipeline_mode=
                # pl.Buffered(1) would drop their redundant double-buffer.
                pl.BlockSpec((N_TAPS * cin, cout), lambda i: (0, 0)),  # packed W
                pl.BlockSpec((1, cout), lambda i: (0, 0)),             # bias
            ],
            out_specs=pl.BlockSpec((rt * w_out, cout), lambda i: (i, 0)),
        ),
        compiler_params=pltpu.CompilerParams(
            dimension_semantics=("parallel",)),
    )(xr, wcol, bcol)

    out = out2d.reshape(rows_pad, w_out, cout)[:rows]         # (B*H, W_out, Cout)
    out = out.reshape(B, H, w_out, cout).transpose(0, 3, 1, 2)  # (B, Cout, H, W_out)
    return out


def _reference(x, weights, biases, dilation_factor):
    """Pure-JAX mirror of the PyTorch forward (4 dilated convs, truncate, cat)."""
    outs = []
    for w, b in zip(weights, biases):
        y = lax.conv_general_dilated(
            x, w, window_strides=(1, 1), padding="VALID",
            rhs_dilation=(1, dilation_factor),
            dimension_numbers=("NCHW", "OIHW", "NCHW"),
            precision=lax.Precision.HIGHEST)
        outs.append(y + b.reshape(1, -1, 1, 1))
    w_last = outs[-1].shape[3]
    outs = [o[..., -w_last:] for o in outs]
    return jnp.concatenate(outs, axis=1)


if __name__ == "__main__":
    # (batch, cin, cout, num_nodes, seq_len); seq chosen so W_out = 8
    B, CIN, COUT, H, W = 2, 32, 32, 4, 20
    DIL = 2
    cout_per = COUT // len(KERNEL_SET)

    key = jax.random.PRNGKey(0)
    keys = jax.random.split(key, 2 * len(KERNEL_SET) + 1)

    weights, biases = [], []
    for i, kern in enumerate(KERNEL_SET):       # PyTorch Conv2d-style init
        bound = 1.0 / ((CIN * kern) ** 0.5)
        weights.append(jax.random.uniform(
            keys[2 * i], (cout_per, CIN, 1, kern), jnp.float32, -bound, bound))
        biases.append(jax.random.uniform(
            keys[2 * i + 1], (cout_per,), jnp.float32, -bound, bound))
    x = jax.random.normal(keys[-1], (B, CIN, H, W), jnp.float32)

    out = dilated_inception_forward(x, weights, biases, dilation_factor=DIL)
    out = jax.block_until_ready(out)

    ref = _reference(x, weights, biases, DIL)
    w_out = W - DIL * (N_TAPS - 1)
    assert out.shape == (B, COUT, H, w_out), out.shape
    assert jnp.allclose(out, ref, atol=1e-3, rtol=1e-3), \
        float(jnp.max(jnp.abs(out - ref)))

    print("KERNEL_OK")
</pallas_src>

<mosaic_0001>
module attributes {stable_mosaic.version = 11 : i64} {
  func.func @_dilated_inception_kernel(%arg0: i32, %arg1: memref<8x20x32xf32, #tpu.memory_space<vmem>>, %arg2: memref<224x32xf32, #tpu.memory_space<vmem>>, %arg3: memref<1x32xf32, #tpu.memory_space<vmem>>, %arg4: memref<64x32xf32, #tpu.memory_space<vmem>>) attributes {dimension_semantics = [#tpu.dimension_semantics<parallel>], iteration_bounds = array<i64: 1>, scalar_prefetch = 0 : i64, scratch_operands = 0 : i64, tpu.core_type = #tpu.core_type<tc>, window_params = [{transform_indices = @transform_0, window_bounds = array<i64: 8, 20, 32>}, {pipeline_mode = #tpu.pipeline_mode<synchronous>, transform_indices = @transform_1, window_bounds = array<i64: 224, 32>}, {pipeline_mode = #tpu.pipeline_mode<synchronous>, transform_indices = @transform_2, window_bounds = array<i64: 1, 32>}, {transform_indices = @transform_3, window_bounds = array<i64: 64, 32>}]} {
    %c0 = arith.constant 0 : index
    %c0_0 = arith.constant 0 : index
    %c0_1 = arith.constant 0 : index
    %0 = vector.load %arg1[%c0, %c0_0, %c0_1] : memref<8x20x32xf32, #tpu.memory_space<vmem>>, vector<8x20x32xf32>
    %1 = vector.extract_strided_slice %0 {offsets = [0, 0, 0], sizes = [8, 8, 32], strides = [1, 1, 1]} : vector<8x20x32xf32> to vector<8x8x32xf32>
    %2 = vector.extract_strided_slice %0 {offsets = [0, 2, 0], sizes = [8, 8, 32], strides = [1, 1, 1]} : vector<8x20x32xf32> to vector<8x8x32xf32>
    %3 = vector.extract_strided_slice %0 {offsets = [0, 4, 0], sizes = [8, 8, 32], strides = [1, 1, 1]} : vector<8x20x32xf32> to vector<8x8x32xf32>
    %4 = vector.extract_strided_slice %0 {offsets = [0, 6, 0], sizes = [8, 8, 32], strides = [1, 1, 1]} : vector<8x20x32xf32> to vector<8x8x32xf32>
    %5 = vector.extract_strided_slice %0 {offsets = [0, 8, 0], sizes = [8, 8, 32], strides = [1, 1, 1]} : vector<8x20x32xf32> to vector<8x8x32xf32>
    %6 = vector.extract_strided_slice %0 {offsets = [0, 10, 0], sizes = [8, 8, 32], strides = [1, 1, 1]} : vector<8x20x32xf32> to vector<8x8x32xf32>
    %7 = vector.extract_strided_slice %0 {offsets = [0, 12, 0], sizes = [8, 8, 32], strides = [1, 1, 1]} : vector<8x20x32xf32> to vector<8x8x32xf32>
    %8 = tpu.concatenate %1, %2, %3, %4, %5, %6, %7 in 2 : vector<8x8x32xf32>, vector<8x8x32xf32>, vector<8x8x32xf32>, vector<8x8x32xf32>, vector<8x8x32xf32>, vector<8x8x32xf32>, vector<8x8x32xf32> -> vector<8x8x224xf32>
    %9 = vector.shape_cast %8 : vector<8x8x224xf32> to vector<64x224xf32>
    %c0_2 = arith.constant 0 : index
    %c0_3 = arith.constant 0 : index
    %10 = vector.load %arg2[%c0_2, %c0_3] : memref<224x32xf32, #tpu.memory_space<vmem>>, vector<224x32xf32>
    %cst = arith.constant dense<0.000000e+00> : vector<64x32xf32>
    %11 = tpu.matmul %9, %10, %cst {dimension_numbers = #tpu.dot_dimension_numbers<[1], [0], [0], [1], [0, 0, 1, 1], [], []>} : vector<64x224xf32>, vector<224x32xf32>, vector<64x32xf32> -> vector<64x32xf32>
    %c0_4 = arith.constant 0 : index
    %c0_5 = arith.constant 0 : index
    %12 = vector.load %arg3[%c0_4, %c0_5] : memref<1x32xf32, #tpu.memory_space<vmem>>, vector<1x32xf32>
    %13 = vector.broadcast %12 : vector<1x32xf32> to vector<64x32xf32>
    %14 = arith.addf %11, %13 : vector<64x32xf32>
    %c0_6 = arith.constant 0 : index
    %c0_7 = arith.constant 0 : index
    %15 = vector.load %arg4[%c0_6, %c0_7] : memref<64x32xf32, #tpu.memory_space<vmem>>, vector<64x32xf32>
    tpu.vector_store %arg4[%c0_6, %c0_7], %14 {strides = array<i32>} : memref<64x32xf32, #tpu.memory_space<vmem>>, vector<64x32xf32>,
    return
  }
  func.func @transform_0(%arg0: i32) -> (i32, i32, i32) {
    %c0_i32 = arith.constant 0 : i32
    %c0_i32_0 = arith.constant 0 : i32
    %c0_i32_1 = arith.constant 0 : i32
    return %arg0, %c0_i32, %c0_i32_0 : i32, i32, i32
  }
  func.func @transform_1(%arg0: i32) -> (i32, i32) {
    %c0_i32 = arith.constant 0 : i32
    %c0_i32_0 = arith.constant 0 : i32
    %c0_i32_1 = arith.constant 0 : i32
    return %c0_i32, %c0_i32_0 : i32, i32
  }
  func.func @transform_2(%arg0: i32) -> (i32, i32) {
    %c0_i32 = arith.constant 0 : i32
    %c0_i32_0 = arith.constant 0 : i32
    %c0_i32_1 = arith.constant 0 : i32
    return %c0_i32, %c0_i32_0 : i32, i32
  }
  func.func @transform_3(%arg0: i32) -> (i32, i32) {
    %c0_i32 = arith.constant 0 : i32
    %c0_i32_0 = arith.constant 0 : i32
    return %arg0, %c0_i32 : i32, i32
  }
}

</mosaic_0001>

<bundles_post_ra>
// kernel: dilated_inception_forward.1
= control target key start
LH: loop header
LB: loop body
LE: loop exit
PB: predicated region body
PF: predicated region fallthrough
CT: control target
= control target key end

     0   :  { %vm153_vm0 = vcmask 1041408   ;;  %vm55_vm1 = vcmask 1045504   ;;  %vm104_vm2 = vcmask 1043456   ;;  %s626_s24 = smov 96   ;;  %s627_s25 = smov 32   ;;  %s1064_s0 = inlined_call_operand.vmem [shape: f32[8,20,32], index: 0, kind: input, shape index: {}]   ;;  %s1065_s1 = inlined_call_operand.vmem [shape: f32[224,32], index: 1, kind: input, shape index: {}]   ;;  %s1066_s2 = inlined_call_operand.vmem [shape: f32[1,32], index: 2, kind: input, shape index: {}]   ;;  %s1067_s3 = inlined_call_operand.hbm [shape: f32[64,32], index: 3, kind: output, shape index: {}]  }
   0x1   :  { %v655_v0 = vld [vmem:[%s1064_s0 + $0x48] sm:$0xff]  ;;  %v660_v1 = vld [vmem:[%s1064_s0 + $0x50] sm:$0xff]  ;;  %v665_v2 = vld [vmem:[%s1064_s0 + $0x60] sm:$0xff] }
   0x2   :  { %v670_v3 = vld [vmem:[%s1064_s0 + $0x68] sm:$0xff]  ;;  %v163_v4 = vrot.slane %v655_v0, 6  ;;  %v164_v5 = vrot.slane %v660_v1, 6  ;;  %v166_v6 = vrot.slane %v665_v2, 6  ;;  %v65_v7 = vrot.slane %v655_v0, 2  ;;  %v705_v24 = vld [vmem:[%s1064_s0] sm:$0xff] }
   0x3   :  { %v167_v8 = vrot.slane %v670_v3, 6  ;;  %v66_v9 = vrot.slane %v660_v1, 2  ;;  %v68_v10 = vrot.slane %v665_v2, 2  ;;  %v69_v11 = vrot.slane %v670_v3, 2  ;;  %v695_v22 = vld [vmem:[%s1064_s0 + $0x8] sm:$0xff] }
   0x4   :  { %v165_v12 = vsel %vm153_vm0, %v163_v4, %v164_v5  ;;  %v114_v13 = vrot.slane %v655_v0, 4  ;;  %v115_v14 = vrot.slane %v660_v1, 4  ;;  %v117_v18 = vrot.slane %v665_v2, 4  ;;  %v17_v23 = vld [vmem:[%s1064_s0 + $0x10] sm:$0xf] }
   0x5   :  { %v168_v15 = vsel %vm153_vm0, %v166_v6, %v167_v8  ;;  %v67_v16 = vsel %vm55_vm1, %v65_v7, %v66_v9  ;;  %v70_v17 = vsel %vm55_vm1, %v68_v10, %v69_v11  ;;  %v118_v21 = vrot.slane %v670_v3, 4 }
   0x6   :  { %v549_v19 = vpack.i.bf16 %v168_v15, %v165_v12  ;;  %v539_v20 = vpack.i.bf16 %v70_v17, %v67_v16  ;;  %v116_v25 = vsel %vm104_vm2, %v114_v13, %v115_v14  ;;  %v57_v27 = vrot.slane %v695_v22, 2 }
   0x7   :  { %v119_v26 = vsel %vm104_vm2, %v117_v18, %v118_v21  ;;  %v210_v28 = vrot.slane %v17_v23, 2 }
   0x8   :  { %550 = vrot.lane.b32.xlu1 %v549_v19, %s626_s24  ;;  %540 = vrot.lane.b32.xlu0 %v539_v20, %s627_s25 }
   0x9   :  { %8 = vsyncpa [#allocation3], 0  ;;  %v717_v29 = vld [vmem:[%s1064_s0 + $0x78] sm:$0xff]  ;;  %v722_v30 = vld [vmem:[%s1064_s0 + $0x80] sm:$0xff]  ;;  %v106_v31 = vrot.slane %v695_v22, 4  ;;  %v250_v32 = vrot.slane %v17_v23, 4  ;;  %v544_v33 = vpack.i.bf16 %v119_v26, %v116_v25  ;;  %v211_v35 = vsel %vm55_vm1, %v57_v27, %v210_v28 }
   0xa   :  { %v105_v34 = vrot.slane %v705_v24, 4  ;;  %v730_v36 = vld [vmem:[%s1064_s0 + $0x20] sm:$0xff]  ;;  %v120_v37 = vrot.slane %v717_v29, 4  ;;  %v121_v38 = vrot.slane %v722_v30, 4  ;;  %v20_v40 = vld [vmem:[%s1064_s0 + $0x28] sm:$0xf] }
   0xb   :  { %v251_v39 = vsel %vm104_vm2, %v106_v31, %v250_v32  ;;  %s628_s9 = smov 64   ;;  %v56_v41 = vrot.slane %v705_v24, 2  ;;  %v72_v42 = vrot.slane %v722_v30, 2  ;;  %v71_v43 = vrot.slane %v717_v29, 2  ;;  %v32_v57 = vld [vmem:[%s1064_s0 + $0x88] sm:$0xf] }
   0xc   :  { %266 = vrot.lane.b32.xlu2 %v251_v39, %s628_s9  ;;  %v60_v44 = vrot.slane %v730_v36, 2  ;;  %v212_v46 = vrot.slane %v20_v40, 2  ;;  %v107_v47 = vsel %vm104_vm2, %v105_v34, %v106_v31  ;;  %v122_v48 = vsel %vm104_vm2, %v120_v37, %v121_v38  ;;  %v766_v63 = vld [vmem:[%s1064_s0 + $0x18] sm:$0xff]  ;;  %v771_v4 = vld [vmem:[%s1064_s0 + $0x90] sm:$0xff]  ;;  %v23_v32 = vld [vmem:[%s1064_s0 + $0x40] sm:$0xf] }
   0xd   :  { %v58_v45 = vsel %vm55_vm1, %v56_v41, %v57_v27  ;;  %v73_v49 = vsel %vm55_vm1, %v71_v43, %v72_v42  ;;  %v154_v51 = vrot.slane %v705_v24, 6  ;;  %v155_v52 = vrot.slane %v695_v22, 6  ;;  %v776_v5 = vld [vmem:[%s1064_s0 + $0x98] sm:$0xff]  ;;  %v29_v41 = vld [vmem:[%s1064_s0 + $0x70] sm:$0xf]  ;;  %s485_s20 = sshll.u32 %s1067_s3, 4  ;;  %s486_s20 = int_to_ptr.hbm [resolvable:$true] %s485_s20 }
   0xe   :  { %v554_v50 = vpack.i.bf16 %v58_v45, %v73_v49  ;;  %v169_v53 = vrot.slane %v717_v29, 6  ;;  %v170_v54 = vrot.slane %v722_v30, 6  ;;  %v559_v55 = vpack.i.bf16 %v107_v47, %v122_v48  ;;  %v799_v31 = vld [vmem:[%s1064_s0 + $0x38] sm:$0xff]  ;;  %v826_v47 = vld [vmem:[%s1064_s0 + $0xa8] sm:$0xff]  ;;  %v831_v48 = vld [vmem:[%s1064_s0 + $0xb0] sm:$0xff]  ;;  %s630_s21 = smov 128  }
   0xf   :  { %v213_v56 = vsel %vm55_vm1, %v60_v44, %v212_v46  ;;  %v156_v58 = vsel %vm153_vm0, %v154_v51, %v155_v52  ;;  %v220_v60 = vrot.slane %v32_v57, 2  ;;  %v109_v61 = vrot.slane %v730_v36, 4  ;;  %v821_v46 = vld [vmem:[%s1064_s0 + $0x30] sm:$0xff] }
  0x10   :  { %545 = vrot.lane.b32.xlu0 %v544_v33, %s628_s9  ;;  %226 = vrot.lane.b32.xlu1 %v211_v35, %s627_s25  ;;  %v171_v59 = vsel %vm153_vm0, %v169_v53, %v170_v54  ;;  %v252_v62 = vrot.slane %v20_v40, 4  ;;  %v108_v8 = vrot.slane %v766_v63, 4  ;;  %v123_v10 = vrot.slane %v771_v4, 4 }
  0x11   :  { %v564_v6 = vpack.i.bf16 %v156_v58, %v171_v59  ;;  %v221_v7 = vsel %vm55_vm1, %v72_v42, %v220_v60  ;;  %v124_v12 = vrot.slane %v776_v5, 4  ;;  %v59_v15 = vrot.slane %v766_v63, 2  ;;  %v348_v59 = vld [vmem:[%s1065_s1 + $0x78] sm:$0xff]  ;;  %v347_v60 = vld [vmem:[%s1065_s1 + $0x70] sm:$0xff] }
  0x12   :  { %v253_v13 = vsel %vm104_vm2, %v109_v61, %v252_v62  ;;  %v74_v16 = vrot.slane %v771_v4, 2  ;;  %v75_v17 = vrot.slane %v776_v5, 2  ;;  %v260_v18 = vrot.slane %v32_v57, 4  ;;  %505 = vmatpush.msra.mxu2 %v348_v59  ;;  %389 = vmatpush.msra.mxu0 %v348_v59 }
  0x13   :  { %v110_v19 = vsel %vm104_vm2, %v108_v8, %v109_v61  ;;  %v125_v20 = vsel %vm104_vm2, %v123_v10, %v124_v12  ;;  %v61_v23 = vsel %vm55_vm1, %v59_v15, %v60_v44  ;;  %v157_v33 = vrot.slane %v766_v63, 6  ;;  %v346_v8 = vld [vmem:[%s1065_s1 + $0x68] sm:$0xff]  ;;  %v359_v10 = vld [vmem:[%s1065_s1 + $0xd0] sm:$0xff] }
  0x14   :  { %555 = vrot.lane.b32.xlu2 %v554_v50, %s627_s25  ;;  %v76_v25 = vsel %vm55_vm1, %v74_v16, %v75_v17  ;;  %v261_v26 = vsel %vm104_vm2, %v121_v38, %v260_v18  ;;  %v574_v27 = vpack.i.bf16 %v110_v19, %v125_v20  ;;  %v158_v34 = vrot.slane %v730_v36, 6  ;;  %506 = vmatpush.msra.mxu2 %v347_v60 }
  0x15   :  { %v569_v28 = vpack.i.bf16 %v61_v23, %v76_v25  ;;  %v172_v35 = vrot.slane %v771_v4, 6  ;;  %v173_v37 = vrot.slane %v776_v5, 6  ;;  %v214_v38 = vrot.slane %v23_v32, 2  ;;  %390 = vmatpush.msra.mxu0 %v347_v60  ;;  %v337_v60 = vld [vmem:[%s1065_s1 + $0x20] sm:$0xff] }
  0x16   :  { %v112_v39 = vrot.slane %v799_v31, 4  ;;  %v254_v40 = vrot.slane %v23_v32, 4  ;;  %v159_v42 = vsel %vm153_vm0, %v157_v33, %v158_v34  ;;  %v63_v44 = vrot.slane %v799_v31, 2  ;;  %507 = vmatpush.msra.mxu2 %v346_v8  ;;  %v357_v32 = vld [vmem:[%s1065_s1 + $0xc0] sm:$0xff] }
  0x17   :  { %v174_v43 = vsel %vm153_vm0, %v172_v35, %v173_v37  ;;  %v258_v45 = vrot.slane %v29_v41, 4  ;;  %v62_v53 = vrot.slane %v821_v46, 2  ;;  %v77_v54 = vrot.slane %v826_v47, 2  ;;  %391 = vmatpush.msra.mxu0 %v346_v8  ;;  %v343_v35 = vld [vmem:[%s1065_s1 + $0x50] sm:$0xff]  ;;  %v356_v37 = vld [vmem:[%s1065_s1 + $0xb8] sm:$0xff]  ;;  %v334_v8 = vld [vmem:[%s1065_s1 + $0x8] sm:$0xff] }
  0x18   :  { %228 = vrot.lane.b32.xlu1 %v213_v56, %s627_s25  ;;  %560 = vrot.lane.b32.xlu0 %v559_v55, %s628_s9  ;;  %v215_v49 = vsel %vm55_vm1, %v63_v44, %v214_v38  ;;  %v579_v51 = vpack.i.bf16 %v159_v42, %v174_v43  ;;  %v255_v52 = vsel %vm104_vm2, %v112_v39, %v254_v40  ;;  %v78_v55 = vrot.slane %v831_v48, 2  ;;  %v35_v56 = vld [vmem:[%s1064_s0 + $0xa0] sm:$0xf]  ;;  %v342_v42 = vld [vmem:[%s1065_s1 + $0x48] sm:$0xff] }
  0x19   :  { %v837_v50 = vsel %vm104_vm2, %v118_v21, %v258_v45  ;;  %v222_v57 = vrot.slane %v35_v56, 2  ;;  %v262_v21 = vrot.slane %v35_v56, 4  ;;  %v218_v58 = vrot.slane %v29_v41, 2  ;;  %v355_v43 = vld [vmem:[%s1065_s1 + $0xb0] sm:$0xff]  ;;  %v341_v45 = vld [vmem:[%s1065_s1 + $0x40] sm:$0xff] }
  0x1a   :  { %v64_v61 = vsel %vm55_vm1, %v62_v53, %v63_v44  ;;  %v79_v62 = vsel %vm55_vm1, %v77_v54, %v78_v55  ;;  %v111_v15 = vrot.slane %v821_v46, 4  ;;  %v126_v16 = vrot.slane %v826_v47, 4  ;;  %v340_v53 = vld [vmem:[%s1065_s1 + $0x38] sm:$0xff] }
  0x1b   :  { %v584_v18 = vpack.i.bf16 %v64_v61, %v79_v62  ;;  %v263_v19 = vsel %vm104_vm2, %v124_v12, %v262_v21  ;;  %v160_v20 = vrot.slane %v821_v46, 6  ;;  %v161_v23 = vrot.slane %v799_v31, 6  ;;  %v26_v12 = vld [vmem:[%s1064_s0 + $0x58] sm:$0xf]  ;;  %v351_v62 = vld [vmem:[%s1065_s1 + $0x90] sm:$0xff] }
  0x1c   :  { %565 = vrot.lane.b32.xlu2 %v564_v6, %s626_s24  ;;  %v360_v6 = vld [vmem:[%s1065_s1 + $0xd8] sm:$0xff]  ;;  %v175_v25 = vrot.slane %v826_v47, 6  ;;  %v113_v33 = vsel %vm104_vm2, %v111_v15, %v112_v39  ;;  %v216_v40 = vrot.slane %v26_v12, 2  ;;  %v256_v54 = vrot.slane %v26_v12, 4 }
  0x1d   :  { %434 = vmatpush.msra.mxu1 %v360_v6  ;;  %521 = vmatpush.msra.mxu3 %v360_v6  ;;  %v162_v38 = vsel %vm153_vm0, %v160_v20, %v161_v23  ;;  %v352_v61 = vld [vmem:[%s1065_s1 + $0x98] sm:$0xff]  ;;  %v335_v6 = vld [vmem:[%s1065_s1 + $0x10] sm:$0xff]  ;;  %vm290_vm3 = vcmask 261120   ;;  %vm299_vm4 = vcmask 523264   ;;  %vm308_vm5 = vcmask 785408  }
  0x1e   :  { %v257_v21 = vsel %vm104_vm2, %v115_v14, %v256_v54  ;;  %v338_v14 = vld [vmem:[%s1065_s1 + $0x28] sm:$0xff] }
  0x1f   :  { %435 = vmatpush.msra.mxu1 %v359_v10  ;;  %522 = vmatpush.msra.mxu3 %v359_v10  ;;  %v349_v10 = vld [vmem:[%s1065_s1 + $0x80] sm:$0xff] }
  0x20   :  { %236 = vrot.lane.b32.xlu1 %v221_v7, %s627_s25  ;;  %268 = vrot.lane.b32.xlu0 %v253_v13, %s628_s9  ;;  %v865_v7 = vsel %vm55_vm1, %v69_v11, %v218_v58  ;;  %v223_v13 = vsel %vm55_vm1, %v75_v17, %v222_v57  ;;  %v358_v11 = vld [vmem:[%s1065_s1 + $0xc8] sm:$0xff]  ;;  %v345_v17 = vld [vmem:[%s1065_s1 + $0x60] sm:$0xff] }
  0x21   :  { %436 = vmatpush.msra.mxu1 %v358_v11  ;;  %508 = vmatpush.msra.mxu2 %v345_v17 }
  0x22   :  { %392 = vmatpush.msra.mxu0 %v345_v17  ;;  %523 = vmatpush.msra.mxu3 %v358_v11 }
  0x23   :  { %437 = vmatpush.msra.mxu1 %v357_v32 }
  0x24   :  { %276 = vrot.lane.b32.xlu2 %v261_v26, %s628_s9  ;;  %v176_v26 = vrot.slane %v831_v48, 6  ;;  %524 = vmatpush.msra.mxu3 %v357_v32 }
  0x25   :  { %438 = vmatpush.msra.mxu1 %v356_v37 }
  0x26   :  { %v177_v39 = vsel %vm153_vm0, %v175_v25, %v176_v26  ;;  %525 = vmatpush.msra.mxu3 %v356_v37 }
  0x27   :  { %v594_v44 = vpack.i.bf16 %v162_v38, %v177_v39  ;;  %439 = vmatpush.msra.mxu1 %v355_v43 }
  0x28   :  { %575 = vrot.lane.b32.xlu1 %v574_v27, %s628_s9  ;;  %570 = vrot.lane.b32.xlu0 %v569_v28, %s627_s25  ;;  %v127_v27 = vrot.slane %v831_v48, 4  ;;  %v344_v28 = vld [vmem:[%s1065_s1 + $0x58] sm:$0xff] }
  0x29   :  { %509 = vmatpush.msra.mxu2 %v344_v28  ;;  %393 = vmatpush.msra.mxu0 %v344_v28 }
  0x2a   :  { %v128_v34 = vsel %vm104_vm2, %v126_v16, %v127_v27  ;;  %526 = vmatpush.msra.mxu3 %v355_v43 }
  0x2b   :  { %v589_v41 = vpack.i.bf16 %v113_v33, %v128_v34  ;;  %510 = vmatpush.msra.mxu2 %v343_v35  ;;  %394 = vmatpush.msra.mxu0 %v343_v35 }
  0x2c   :  { %230 = vrot.lane.b32.xlu2 %v215_v49, %s627_s25  ;;  %v354_v49 = vld [vmem:[%s1065_s1 + $0xa8] sm:$0xff] }
  0x2d   :  { %511 = vmatpush.msra.mxu2 %v342_v42  ;;  %395 = vmatpush.msra.mxu0 %v342_v42 }
  0x2e   :  { %440 = vmatpush.msra.mxu1 %v354_v49  ;;  %527 = vmatpush.msra.mxu3 %v354_v49 }
  0x2f   :  { %512 = vmatpush.msra.mxu2 %v341_v45  ;;  %396 = vmatpush.msra.mxu0 %v341_v45 }
  0x30   :  { %270 = vrot.lane.b32.xlu1 %v255_v52, %s628_s9  ;;  %580 = vrot.lane.b32.xlu0 %v579_v51, %s626_s24  ;;  %v217_v51 = vsel %vm55_vm1, %v66_v9, %v216_v40  ;;  %v38_v52 = vld [vmem:[%s1064_s0 + $0xb8] sm:$0xf]  ;;  %v339_v9 = vld [vmem:[%s1065_s1 + $0x30] sm:$0xff]  ;;  %s631_s0 = smov 8  }
  0x31   :  { %v224_v56 = vrot.slane %v38_v52, 2  ;;  %v264_v57 = vrot.slane %v38_v52, 4  ;;  %513 = vmatpush.msra.mxu2 %v340_v53  ;;  %397 = vmatpush.msra.mxu0 %v340_v53 }
  0x33   :  { %514 = vmatpush.msra.mxu2 %v339_v9  ;;  %v225_v58 = vsel %vm55_vm1, %v78_v55, %v224_v56  ;;  %v265_v59 = vsel %vm104_vm2, %v127_v27, %v264_v57  ;;  %398 = vmatpush.msra.mxu0 %v339_v9  ;;  %v353_v55 = vld [vmem:[%s1065_s1 + $0xa0] sm:$0xff] }
  0x34   :  { %238 = vrot.lane.b32.xlu2 %v223_v13, %s627_s25  ;;  %441 = vmatpush.msra.mxu1 %v353_v55  ;;  %v333_v13 = vld [vmem:[%s1065_s1] sm:$0xff] }
  0x35   :  { %515 = vmatpush.msra.mxu2 %v338_v14  ;;  %399 = vmatpush.msra.mxu0 %v338_v14 }
  0x36   :  { %528 = vmatpush.msra.mxu3 %v353_v55  ;;  %442 = vmatpush.msra.mxu1 %v352_v61 }
  0x37   :  { %516 = vmatpush.msra.mxu2 %v337_v60  ;;  %400 = vmatpush.msra.mxu0 %v337_v60 }
  0x38   :  { %585 = vrot.lane.b32.xlu1 %v584_v18, %s627_s25  ;;  %278 = vrot.lane.b32.xlu0 %v263_v19, %s628_s9 }
  0x39   :  { %529 = vmatpush.msra.mxu3 %v352_v61  ;;  %443 = vmatpush.msra.mxu1 %v351_v62 }
  0x3b   :  { %530 = vmatpush.msra.mxu3 %v351_v62 }
  0x3c   :  { %590 = vrot.lane.b32.xlu2 %v589_v41, %s628_s9 }
  0x40   :  { %595 = vrot.lane.b32.xlu1 %v594_v44, %s626_s24  ;;  %232 = vrot.lane.b32.xlu0 %v217_v51, %s627_s25 }
  0x44   :  { %272 = vrot.lane.b32.xlu2 %v257_v21, %s628_s9 }
  0x48   :  { %240 = vrot.lane.b32.xlu0 %v225_v58, %s627_s25  ;;  %280 = vrot.lane.b32.xlu1 %v265_v59, %s628_s9 }
  0x4c   :  { %234 = vrot.lane.b32.xlu2 %v865_v7, %s627_s25  ;;  %v350_v7 = vld [vmem:[%s1065_s1 + $0x88] sm:$0xff] }
  0x4d   :  { %444 = vmatpush.msra.mxu1 %v350_v7  ;;  %531 = vmatpush.msra.mxu3 %v350_v7 }
  0x4f   :  { %445 = vmatpush.msra.mxu1 %v349_v10  ;;  %532 = vmatpush.msra.mxu3 %v349_v10 }
  0x50   :  { %274 = vrot.lane.b32.xlu0 %v837_v50, %s628_s9  ;;  %v336_v50 = vld [vmem:[%s1065_s1 + $0x18] sm:$0xff] }
  0x51   :  { %517 = vmatpush.msra.mxu2 %v336_v50  ;;  %401 = vmatpush.msra.mxu0 %v336_v50 }
  0x53   :  { %518 = vmatpush.msra.mxu2 %v335_v6  ;;  %402 = vmatpush.msra.mxu0 %v335_v6 }
  0x55   :  { %519 = vmatpush.msra.mxu2 %v334_v8  ;;  %403 = vmatpush.msra.mxu0 %v334_v8 }
  0x57   :  { %520 = vmatpush.msra.mxu2 %v333_v13  ;;  %404 = vmatpush.msra.mxu0 %v333_v13 }
  0x66   :  { %v267_v15 = vpop.permute.xlu2 %266 }
  0x6e   :  { %v556_v16 = vpop.permute.xlu2 %555 }
  0x6f   :  { %v558_v34 = vunpack.i.h.bf16 %v556_v16  ;;  %v557_v45 = vunpack.i.l.bf16 %v556_v16 }
  0x71   :  { %v291_v41 = vsel %vm290_vm3, %v705_v24, %v558_v34  ;;  %v296_v24 = vsel %vm290_vm3, %v717_v29, %v557_v45 }
  0x76   :  { %v566_v19 = vpop.permute.xlu2 %565 }
  0x77   :  { %v567_v54 = vunpack.i.l.bf16 %v566_v19 }
  0x7a   :  { %v551_v11 = vpop.permute.xlu1 %550  ;;  %v541_v18 = vpop.permute.xlu0 %540 }
  0x7b   :  { %v542_v20 = vunpack.i.l.bf16 %v541_v18  ;;  %v552_v27 = vunpack.i.l.bf16 %v551_v11  ;;  %v543_v33 = vunpack.i.h.bf16 %v541_v18  ;;  %v553_v44 = vunpack.i.h.bf16 %v551_v11 }
  0x7d   :  { %v294_v28 = vsel %vm290_vm3, %v655_v0, %v542_v20  ;;  %v295_v0 = vsel %vm290_vm3, %v665_v2, %v543_v33 }
  0x7e   :  { %v277_v38 = vpop.permute.xlu2 %276 }
  0x82   :  { %v546_v17 = vpop.permute.xlu0 %545  ;;  %v227_v23 = vpop.permute.xlu1 %226 }
  0x83   :  { %v547_v25 = vunpack.i.l.bf16 %v546_v17  ;;  %v317_v26 = vsel %vm290_vm3, %v695_v22, %v227_v23  ;;  %v548_v37 = vunpack.i.h.bf16 %v546_v17  ;;  %v568_v22 = vunpack.i.h.bf16 %v566_v19 }
  0x84   :  { %v325_v12 = vsel %vm299_vm4, %v317_v26, %v267_v15 }
  0x85   :  { %497 = vmatmul.msk.f32.vlgmr.msra.gmra.mxu1 %vm308_vm5, %v325_v12  ;;  %v303_v32 = vsel %vm299_vm4, %v294_v28, %v547_v25  ;;  %v304_v43 = vsel %vm299_vm4, %v295_v0, %v548_v37 }
  0x86   :  { %v312_v35 = vsel %vm308_vm5, %v303_v32, %v552_v27  ;;  %v313_v52 = vsel %vm308_vm5, %v304_v43, %v553_v44  ;;  %v231_v59 = vpop.permute.xlu2 %230 }
  0x87   :  { %414 = vmatmul.f32.vlgmr.msra.gmra.mxu2 %v312_v35  ;;  %v319_v6 = vsel %vm290_vm3, %v799_v31, %v231_v59 }
  0x8a   :  { %v229_v39 = vpop.permute.xlu1 %228  ;;  %v561_v40 = vpop.permute.xlu0 %560 }
  0x8b   :  { %v563_v42 = vunpack.i.h.bf16 %v561_v40  ;;  %v562_v53 = vunpack.i.l.bf16 %v561_v40  ;;  %v318_v2 = vsel %vm290_vm3, %v730_v36, %v229_v39 }
  0x8d   :  { %v300_v49 = vsel %vm299_vm4, %v291_v41, %v563_v42  ;;  %v305_v58 = vsel %vm299_vm4, %v296_v24, %v562_v53  ;;  %v599_v53 = vld [vmem:[%s1066_s2] ss:$0 sm:$0xff]  ;;  %s629_s2 = smov [#allocation2]  }
  0x8e   :  { %v309_v51 = vsel %vm308_vm5, %v300_v49, %v568_v22  ;;  %v314_v29 = vsel %vm308_vm5, %v305_v58, %v567_v54  ;;  %v239_v50 = vpop.permute.xlu2 %238  ;;  %s483_s17 = sshll.u32 %s629_s2, 4  ;;  %s484_s17 = int_to_ptr.vmem [resolvable:$true] %s483_s17 }
  0x8f   :  { %405 = vmatmul.f32.vlgmr.msra.gmra.mxu0 %v309_v51  ;;  %417 = vmatmul.f32.gmra.mxu2 %v313_v52 }
  0x92   :  { %v237_v9 = vpop.permute.xlu1 %236  ;;  %v269_v56 = vpop.permute.xlu0 %268 }
  0x93   :  { %v322_v57 = vsel %vm290_vm3, %v722_v30, %v237_v9  ;;  %v326_v21 = vsel %vm299_vm4, %v318_v2, %v269_v56 }
  0x94   :  { %498 = vmatmul.msk.f32.gmra.mxu1 %vm308_vm5, %v326_v21  ;;  %v330_v14 = vsel %vm299_vm4, %v322_v57, %v277_v38 }
  0x95   :  { %502 = vmatmul.msk.f32.vlgmr.msra.gmra.mxu3 %vm308_vm5, %v330_v14 }
  0x97   :  { %420 = vmatmul.f32.gmra.mxu2 %v314_v29 }
  0x9a   :  { %v576_v36 = vpop.permute.xlu1 %575  ;;  %v571_v55 = vpop.permute.xlu0 %570 }
  0x9b   :  { %v573_v60 = vunpack.i.h.bf16 %v571_v55  ;;  %v572_v61 = vunpack.i.l.bf16 %v571_v55  ;;  %v578_v30 = vunpack.i.h.bf16 %v576_v36  ;;  %v577_v62 = vunpack.i.l.bf16 %v576_v36 }
  0x9d   :  { %v292_v7 = vsel %vm290_vm3, %v766_v63, %v573_v60  ;;  %v297_v8 = vsel %vm290_vm3, %v771_v4, %v572_v61  ;;  %v591_v63 = vpop.permute.xlu2 %590  ;;  %v323_v4 = vsel %vm290_vm3, %v776_v5, %v239_v50 }
  0x9e   :  { %v301_v18 = vsel %vm299_vm4, %v292_v7, %v578_v30  ;;  %v306_v19 = vsel %vm299_vm4, %v297_v8, %v577_v62  ;;  %v593_v12 = vunpack.i.h.bf16 %v591_v63  ;;  %v592_v28 = vunpack.i.l.bf16 %v591_v63 }
  0xa2   :  { %v271_v10 = vpop.permute.xlu1 %270  ;;  %v581_v13 = vpop.permute.xlu0 %580 }
  0xa3   :  { %v583_v15 = vunpack.i.h.bf16 %v581_v13  ;;  %v582_v16 = vunpack.i.l.bf16 %v581_v13  ;;  %v327_v11 = vsel %vm299_vm4, %v319_v6, %v271_v10 }
  0xa4   :  { %499 = vmatmul.msk.f32.gmra.mxu1 %vm308_vm5, %v327_v11 }
  0xa5   :  { %v310_v31 = vsel %vm308_vm5, %v301_v18, %v583_v15  ;;  %v315_v20 = vsel %vm308_vm5, %v306_v19, %v582_v16  ;;  %v273_v32 = vpop.permute.xlu2 %272 }
  0xa6   :  { %408 = vmatmul.f32.gmra.mxu0 %v310_v31  ;;  %423 = vmatmul.f32.gmra.mxu2 %v315_v20 }
  0xaa   :  { %v586_v17 = vpop.permute.xlu1 %585  ;;  %v279_v23 = vpop.permute.xlu0 %278 }
  0xab   :  { %v331_v25 = vsel %vm299_vm4, %v323_v4, %v279_v23  ;;  %v588_v26 = vunpack.i.h.bf16 %v586_v17  ;;  %v587_v27 = vunpack.i.l.bf16 %v586_v17 }
  0xac   :  { %503 = vmatmul.msk.f32.gmra.mxu3 %vm308_vm5, %v331_v25 }
  0xad   :  { %v293_v33 = vsel %vm290_vm3, %v821_v46, %v588_v26  ;;  %v298_v34 = vsel %vm290_vm3, %v826_v47, %v587_v27  ;;  %v235_v44 = vpop.permute.xlu2 %234 }
  0xae   :  { %v302_v22 = vsel %vm299_vm4, %v293_v33, %v593_v12  ;;  %v307_v41 = vsel %vm299_vm4, %v298_v34, %v592_v28  ;;  %v321_v45 = vsel %vm290_vm3, %v670_v3, %v235_v44 }
  0xb2   :  { %v596_v35 = vpop.permute.xlu1 %595  ;;  %v233_v37 = vpop.permute.xlu0 %232 }
  0xb3   :  { %v598_v5 = vunpack.i.h.bf16 %v596_v35  ;;  %v597_v38 = vunpack.i.l.bf16 %v596_v35  ;;  %v320_v39 = vsel %vm290_vm3, %v660_v1, %v233_v37 }
  0xb4   :  { %v328_v40 = vsel %vm299_vm4, %v320_v39, %v273_v32 }
  0xb5   :  { %500 = vmatmul.msk.f32.gmra.mxu1 %vm308_vm5, %v328_v40  ;;  %v311_v46 = vsel %vm308_vm5, %v302_v22, %v598_v5  ;;  %v316_v0 = vsel %vm308_vm5, %v307_v41, %v597_v38 }
  0xb6   :  { %411 = vmatmul.f32.gmra.mxu0 %v311_v46  ;;  %426 = vmatmul.f32.gmra.mxu2 %v316_v0 }
  0xba   :  { %v241_v47 = vpop.permute.xlu0 %240  ;;  %v281_v42 = vpop.permute.xlu1 %280 }
  0xbb   :  { %v324_v43 = vsel %vm290_vm3, %v831_v48, %v241_v47 }
  0xbc   :  { %v332_v1 = vsel %vm299_vm4, %v324_v43, %v281_v42 }
  0xbd   :  { %504 = vmatmul.msk.f32.gmra.mxu3 %vm308_vm5, %v332_v1 }
  0xc2   :  { %v275_v49 = vpop.permute.xlu0 %274 }
  0xc3   :  { %v329_v51 = vsel %vm299_vm4, %v321_v45, %v275_v49 }
  0xc4   :  { %501 = vmatmul.msk.f32.gmra.mxu1 %vm308_vm5, %v329_v51 }
 0x102   :  { %v447_v2 = vpop.f32.mrf.mxu1 }
 0x10a   :  { %v415_v52 = vpop.f32.mrf.mxu2 }
 0x10b   :  { %v416_v30 = vadd.f32 %v599_v53, %v415_v52 }
 0x10c   :  { %v406_v24 = vpop.f32.mrf.mxu0 }
 0x10d   :  { %v407_v48 = vadd.f32 %v599_v53, %v406_v24 }
 0x10f   :  { %v448_v54 = vadd.f32 %v447_v2, %v407_v48 }
 0x111   :  { %471 = vst.msk [vmem:[#allocation2] sm:$0xff] %vm290_vm3, %v448_v54  ;;  %v450_v58 = vpop.f32.mrf.mxu1 }
 0x112   :  { %v418_v9 = vpop.f32.mrf.mxu2 }
 0x113   :  { %v419_v16 = vadd.f32 %v599_v53, %v418_v9 }
 0x118   :  { %v462_v3 = vpop.f32.mrf.mxu3 }
 0x11a   :  { %v421_v56 = vpop.f32.mrf.mxu2 }
 0x11b   :  { %v422_v57 = vadd.f32 %v599_v53, %v421_v56 }
 0x11d   :  { %v463_v21 = vadd.f32 %v462_v3, %v422_v57 }
 0x11f   :  { %476 = vst.msk [vmem:[#allocation2 + $0x28] sm:$0xff] %vm290_vm3, %v463_v21 }
 0x121   :  { %v453_v36 = vpop.f32.mrf.mxu1 }
 0x123   :  { %v409_v59 = vpop.f32.mrf.mxu0 }
 0x124   :  { %v410_v14 = vadd.f32 %v599_v53, %v409_v59 }
 0x126   :  { %v451_v29 = vadd.f32 %v450_v58, %v410_v14 }
 0x128   :  { %472 = vst.msk [vmem:[#allocation2 + $0x8] sm:$0xff] %vm290_vm3, %v451_v29 }
 0x129   :  { %v424_v55 = vpop.f32.mrf.mxu2 }
 0x12a   :  { %v425_v60 = vadd.f32 %v599_v53, %v424_v55 }
 0x12f   :  { %v465_v61 = vpop.f32.mrf.mxu3 }
 0x130   :  { %v466_v50 = vadd.f32 %v465_v61, %v425_v60 }
 0x132   :  { %477 = vst.msk [vmem:[#allocation2 + $0x30] sm:$0xff] %vm290_vm3, %v466_v50  ;;  %v456_v62 = vpop.f32.mrf.mxu1 }
 0x133   :  { %v457_v6 = vadd.f32 %v456_v62, %v416_v30  ;;  %v412_v7 = vpop.f32.mrf.mxu0 }
 0x134   :  { %v413_v8 = vadd.f32 %v599_v53, %v412_v7 }
 0x135   :  { %474 = vst.msk [vmem:[#allocation2 + $0x18] sm:$0xff] %vm290_vm3, %v457_v6 }
 0x136   :  { %v454_v10 = vadd.f32 %v453_v36, %v413_v8 }
 0x138   :  { %473 = vst.msk [vmem:[#allocation2 + $0x10] sm:$0xff] %vm290_vm3, %v454_v10 }
 0x139   :  { %v427_v13 = vpop.f32.mrf.mxu2 }
 0x13a   :  { %v428_v15 = vadd.f32 %v599_v53, %v427_v13 }
 0x140   :  { %v468_v11 = vpop.f32.mrf.mxu3 }
 0x141   :  { %v469_v18 = vadd.f32 %v468_v11, %v428_v15  ;;  %v459_v19 = vpop.f32.mrf.mxu1 }
 0x142   :  { %v460_v31 = vadd.f32 %v459_v19, %v419_v16 }
 0x143   :  { %478 = vst.msk [vmem:[#allocation2 + $0x38] sm:$0xff] %vm290_vm3, %v469_v18 }
 0x144   :  { %475 = vst.msk [vmem:[#allocation2 + $0x20] sm:$0xff] %vm290_vm3, %v460_v31 }
 0x145   :  { %491 = dma.vmem_to_hbm [thread:$0]  %s484_s17, 1024, %s486_s20, [#allocation3], %s630_s21, %s630_s21, %s631_s0  }
 0x146   :  { %624 = dma.done.wait [#allocation3], 1024  }
 0x147   :  { %625 = vsyncadd [#allocation3], 4294966272 }
 0x148   :  { %496 = vsyncpa [#allocation3], 1 }

</bundles_post_ra>
